<compile_context>
chip_gen: v6e
topology: v6e:2x2x1
jax: 0.10.0
libtpu: 0.0.40
codegen_flags: <defaults>
</compile_context>

<pallas_src>
import functools

import jax
import jax.numpy as jnp
from jax.experimental import pallas as pl
from jax.experimental.pallas import tpu as pltpu


def _layernorm_kernel(alpha_ref, bias_ref, x_ref, o_ref, *, eps: float,
                      hidden: int):
    # x_ref: (TILE_ROWS, HIDDEN) block in VMEM, native dtype. Upcast here only.
    x = x_ref[...].astype(jnp.float32)

    # Single-sweep statistics (read x once for both sums).
    s1 = jnp.sum(x, axis=-1, keepdims=True)
    s2 = jnp.sum(x * x, axis=-1, keepdims=True)
    mean = s1 * jnp.float32(1.0 / hidden)
    # Unbiased (N-1) variance, E[x^2]-type form; clamp tiny negatives from
    # floating-point cancellation.
    var = (s2 - s1 * mean) * jnp.float32(1.0 / max(hidden - 1, 1))
    var = jnp.maximum(var, jnp.float32(0.0))
    std = jnp.sqrt(var)

    alpha = alpha_ref[0, 0]
    bias = bias_ref[0, 0]

    # Per-row (tile_rows, 1) scale/shift with alpha, bias and mean folded in,
    # so the per-element epilogue is a single fused multiply-add.
    scale = alpha * pl.reciprocal(std + jnp.float32(eps), approx=False)
    shift = bias - mean * scale
    o_ref[...] = (x * scale + shift).astype(o_ref.dtype)


def _sublane_multiple(itemsize: int) -> int:
    # f32 -> 8, bf16/f16 -> 16, int8/fp8 -> 32 (minimum packed tile rows).
    return {4: 8, 2: 16, 1: 32}.get(itemsize, 8)


def _vmem_capacity_bytes() -> int:
    try:
        cap = getattr(pltpu.get_tpu_info(), "vmem_capacity_bytes", None)
        if cap:
            return int(cap)
    except Exception:
        pass
    return 64 * 1024 * 1024  # conservative fallback (v7x-sized)


def _pick_tiling(rows: int, hidden: int, itemsize: int):
    """Generation-aware (tile_rows, vmem_limit_bytes) for a mem-bound kernel."""
    vmem = _vmem_capacity_bytes()
    if vmem >= 128 * 1024 * 1024:          # v5e / v6e
        target_block_bytes = 8 * 1024 * 1024
        vmem_limit = 96 * 1024 * 1024
    else:                                  # v7x (64 MiB per TC)
        target_block_bytes = 6 * 1024 * 1024
        vmem_limit = 40 * 1024 * 1024

    sub = _sublane_multiple(itemsize)
    row_bytes = max(hidden * itemsize, 1)
    tile_rows = max(sub, target_block_bytes // row_bytes)
    if tile_rows >= rows:
        # Single block covering the whole array: block dim == array dim is
        # always a legal block shape, regardless of divisibility.
        tile_rows = rows
    else:
        # Multiple blocks: keep the row-block a multiple of the sublane pack;
        # the partial last block (if any) is masked by Pallas.
        tile_rows = max(sub, (tile_rows // sub) * sub)

    # Guard for very wide `hidden`: even the minimum tile may exceed the
    # budget once double-buffered in+out plus the f32 temp are accounted for.
    block_bytes = tile_rows * row_bytes
    need = 4 * block_bytes + tile_rows * hidden * 4 + (1 << 20)
    if need > vmem_limit:
        vmem_limit = min(need, vmem - 8 * 1024 * 1024)

    return tile_rows, vmem_limit


def layer_normalization(x: jax.Array,
                        alpha: jax.Array,
                        bias: jax.Array,
                        eps: float = 1e-6,
                        tile_rows: int | None = None) -> jax.Array:
    """LayerNormalization forward pass as a Pallas TPU kernel.

    x:     (..., hidden)  -- reduction over the last axis (hidden >= 2)
    alpha: scalar parameter (shape (1,))
    bias:  scalar parameter (shape (1,))
    """
    orig_shape = x.shape
    hidden = orig_shape[-1]
    x2d = x.reshape(-1, hidden)
    rows = x2d.shape[0]

    itemsize = jnp.dtype(x.dtype).itemsize
    auto_rows, vmem_limit = _pick_tiling(rows, hidden, itemsize)
    if tile_rows is None:
        tile_rows = auto_rows
    else:
        # Sanitize user-provided tile: == rows, or a dtype-aware sublane multiple.
        sub = _sublane_multiple(itemsize)
        if tile_rows >= rows:
            tile_rows = rows
        else:
            tile_rows = max(sub, (tile_rows // sub) * sub)

    grid = pl.cdiv(rows, tile_rows)

    alpha_smem = alpha.reshape(1, 1).astype(jnp.float32)
    bias_smem = bias.reshape(1, 1).astype(jnp.float32)

    kernel = functools.partial(_layernorm_kernel, eps=eps, hidden=hidden)

    cost = pl.CostEstimate(
        flops=5 * rows * hidden,
        transcendentals=2 * rows,                      # sqrt + reciprocal per row
        bytes_accessed=2 * rows * hidden * itemsize,   # one read + one write pass
    )

    out2d = pl.pallas_call(
        kernel,
        out_shape=jax.ShapeDtypeStruct((rows, hidden), x.dtype),
        grid_spec=pltpu.PrefetchScalarGridSpec(
            num_scalar_prefetch=0,
            grid=(grid,),
            in_specs=[
                pl.BlockSpec(memory_space=pltpu.MemorySpace.SMEM),  # alpha
                pl.BlockSpec(memory_space=pltpu.MemorySpace.SMEM),  # bias
                pl.BlockSpec((tile_rows, hidden), lambda i: (i, 0)),
            ],
            out_specs=pl.BlockSpec((tile_rows, hidden), lambda i: (i, 0)),
        ),
        compiler_params=pltpu.CompilerParams(
            # "parallel" is near-zero on v5e/v6e (1 TC) and shards the row
            # grid across the 2 TCs on v7x.
            dimension_semantics=("parallel",),
            vmem_limit_bytes=vmem_limit,
        ),
        cost_estimate=cost,
    )(alpha_smem, bias_smem, x2d)

    return out2d.reshape(orig_shape)


def _reference(x, alpha, bias, eps=1e-6):
    x = x.astype(jnp.float32)
    mean = jnp.mean(x, axis=-1, keepdims=True)
    var = jnp.sum((x - mean) ** 2, axis=-1, keepdims=True) / (x.shape[-1] - 1)
    std = jnp.sqrt(var)
    return alpha * (x - mean) / (std + eps) + bias


if __name__ == "__main__":
    key = jax.random.PRNGKey(0)

    # Shapes implied by the transformer module: (batch, seq, hidden).
    batch, seq, hidden = 2, 8, 32
    x = jax.random.normal(key, (batch, seq, hidden), dtype=jnp.float32)

    # Deterministic parameter init, matching nn.Parameter(torch.ones(1)) / zeros(1).
    alpha = jnp.ones((1,), dtype=jnp.float32)
    bias = jnp.zeros((1,), dtype=jnp.float32)

    out = layer_normalization(x, alpha, bias, eps=1e-6)
    out = jax.block_until_ready(out)

    ref = _reference(x, alpha[0], bias[0], eps=1e-6)
    assert out.shape == x.shape
    assert jnp.allclose(out, ref, atol=1e-5, rtol=1e-5), (
        f"max abs err: {jnp.max(jnp.abs(out - ref))}")

    # Second check: rows not divisible by the row tile -> exercises the
    # cdiv grid + masked partial last block.
    key2 = jax.random.PRNGKey(0)
    x2 = jax.random.normal(key2, (4, 5, 256), dtype=jnp.float32)  # rows = 20
    out2 = jax.block_until_ready(
        layer_normalization(x2, alpha, bias, eps=1e-6, tile_rows=8))
    ref2 = _reference(x2, alpha[0], bias[0], eps=1e-6)
    assert jnp.allclose(out2, ref2, atol=1e-5, rtol=1e-5), (
        f"max abs err (partial block): {jnp.max(jnp.abs(out2 - ref2))}")

    # Third check: bf16 input exercises dtype-aware (multiple-of-16) tiling
    # and the native-dtype HBM path with in-kernel f32 upcast.
    x3 = jax.random.normal(jax.random.PRNGKey(0), (16, 512),
                           dtype=jnp.bfloat16)
    out3 = jax.block_until_ready(layer_normalization(x3, alpha, bias, eps=1e-6))
    ref3 = _reference(x3, alpha[0], bias[0], eps=1e-6).astype(jnp.bfloat16)
    assert jnp.allclose(out3.astype(jnp.float32), ref3.astype(jnp.float32),
                        atol=2e-2, rtol=2e-2), (
        f"max abs err (bf16): "
        f"{jnp.max(jnp.abs(out3.astype(jnp.float32) - ref3.astype(jnp.float32)))}")

    print("KERNEL_OK")
</pallas_src>

<mosaic_0001>
module attributes {stable_mosaic.version = 11 : i64} {
  func.func @_layernorm_kernel(%arg0: i32, %arg1: memref<1x1xf32, #tpu.memory_space<smem>>, %arg2: memref<1x1xf32, #tpu.memory_space<smem>>, %arg3: memref<16x32xf32, #tpu.memory_space<vmem>>, %arg4: memref<16x32xf32, #tpu.memory_space<vmem>>) attributes {dimension_semantics = [#tpu.dimension_semantics<parallel>], iteration_bounds = array<i64: 1>, scalar_prefetch = 0 : i64, scratch_operands = 0 : i64, tpu.core_type = #tpu.core_type<tc>, window_params = [{transform_indices = @transform_0, window_bounds = array<i64: 1, 1>}, {transform_indices = @transform_1, window_bounds = array<i64: 1, 1>}, {transform_indices = @transform_2, window_bounds = array<i64: 16, 32>}, {transform_indices = @transform_3, window_bounds = array<i64: 16, 32>}]} {
    %c0 = arith.constant 0 : index
    %c0_0 = arith.constant 0 : index
    %0 = vector.load %arg3[%c0, %c0_0] : memref<16x32xf32, #tpu.memory_space<vmem>>, vector<16x32xf32>
    %cst = arith.constant dense<0.000000e+00> : vector<16xf32>
    %1 = vector.multi_reduction <add>, %0, %cst [1] : vector<16x32xf32> to vector<16xf32>
    %2 = vector.shape_cast %1 : vector<16xf32> to vector<16x1xf32>
    %3 = arith.mulf %0, %0 : vector<16x32xf32>
    %cst_1 = arith.constant dense<0.000000e+00> : vector<16xf32>
    %4 = vector.multi_reduction <add>, %3, %cst_1 [1] : vector<16x32xf32> to vector<16xf32>
    %5 = vector.shape_cast %4 : vector<16xf32> to vector<16x1xf32>
    %cst_2 = arith.constant 3.125000e-02 : f32
    %6 = vector.broadcast %cst_2 : f32 to vector<16x1xf32>
    %7 = arith.mulf %2, %6 : vector<16x1xf32>
    %8 = arith.mulf %2, %7 : vector<16x1xf32>
    %9 = arith.subf %5, %8 : vector<16x1xf32>
    %cst_3 = arith.constant 0.0322580636 : f32
    %10 = vector.broadcast %cst_3 : f32 to vector<16x1xf32>
    %11 = arith.mulf %9, %10 : vector<16x1xf32>
    %cst_4 = arith.constant 0.000000e+00 : f32
    %12 = vector.broadcast %cst_4 : f32 to vector<16x1xf32>
    %13 = arith.maximumf %11, %12 : vector<16x1xf32>
    %14 = math.sqrt %13 : vector<16x1xf32>
    %c0_5 = arith.constant 0 : index
    %c0_6 = arith.constant 0 : index
    %15 = memref.load %arg1[%c0_5, %c0_6] : memref<1x1xf32, #tpu.memory_space<smem>>
    %c0_7 = arith.constant 0 : index
    %c0_8 = arith.constant 0 : index
    %16 = memref.load %arg2[%c0_7, %c0_8] : memref<1x1xf32, #tpu.memory_space<smem>>
    %cst_9 = arith.constant 9.99999997E-7 : f32
    %17 = vector.broadcast %cst_9 : f32 to vector<16x1xf32>
    %18 = arith.addf %14, %17 : vector<16x1xf32>
    %19 = tpu.reciprocal %18 : vector<16x1xf32> -> vector<16x1xf32>
    %20 = vector.broadcast %15 : f32 to vector<16x1xf32>
    %21 = arith.mulf %20, %19 : vector<16x1xf32>
    %22 = arith.mulf %7, %21 : vector<16x1xf32>
    %23 = vector.broadcast %16 : f32 to vector<16x1xf32>
    %24 = arith.subf %23, %22 : vector<16x1xf32>
    %25 = vector.broadcast %21 : vector<16x1xf32> to vector<16x32xf32>
    %26 = arith.mulf %0, %25 : vector<16x32xf32>
    %27 = vector.broadcast %24 : vector<16x1xf32> to vector<16x32xf32>
    %28 = arith.addf %26, %27 : vector<16x32xf32>
    %c0_10 = arith.constant 0 : index
    %c0_11 = arith.constant 0 : index
    %29 = vector.load %arg4[%c0_10, %c0_11] : memref<16x32xf32, #tpu.memory_space<vmem>>, vector<16x32xf32>
    tpu.vector_store %arg4[%c0_10, %c0_11], %28 {strides = array<i32>} : memref<16x32xf32, #tpu.memory_space<vmem>>, vector<16x32xf32>,
    return
  }
  func.func @transform_0(%arg0: i32) -> (i32, i32) {
    %c0_i32 = arith.constant 0 : i32
    %c0_i32_0 = arith.constant 0 : i32
    %c0_i32_1 = arith.constant 0 : i32
    return %c0_i32, %c0_i32_0 : i32, i32
  }
  func.func @transform_1(%arg0: i32) -> (i32, i32) {
    %c0_i32 = arith.constant 0 : i32
    %c0_i32_0 = arith.constant 0 : i32
    %c0_i32_1 = arith.constant 0 : i32
    return %c0_i32, %c0_i32_0 : i32, i32
  }
  func.func @transform_2(%arg0: i32) -> (i32, i32) {
    %c0_i32 = arith.constant 0 : i32
    %c0_i32_0 = arith.constant 0 : i32
    return %arg0, %c0_i32 : i32, i32
  }
  func.func @transform_3(%arg0: i32) -> (i32, i32) {
    %c0_i32 = arith.constant 0 : i32
    %c0_i32_0 = arith.constant 0 : i32
    return %arg0, %c0_i32 : i32, i32
  }
}

</mosaic_0001>

<bundles_post_ra>
// kernel: tpu_custom_call.1
= control target key start
LH: loop header
LB: loop body
LE: loop exit
PB: predicated region body
PF: predicated region fallthrough
CT: control target
= control target key end

     0   :  { %10 = vsyncpa [#allocation5], 0  ;;  %s213_s0 = inlined_call_operand.<no memory space> [shape: f32[1,1], index: 0, kind: input, shape index: {}]   ;;  %s214_s1 = inlined_call_operand.<no memory space> [shape: f32[1,1], index: 1, kind: input, shape index: {}]   ;;  %s215_s2 = inlined_call_operand.hbm [shape: f32[16,32], index: 2, kind: input, shape index: {}]   ;;  %s216_s3 = inlined_call_operand.hbm [shape: f32[16,32], index: 3, kind: output, shape index: {}]  }
   0x1   :  { %11 = vsyncpa [#allocation6], 0  ;;  %s165_s12 = smov [#allocation4]  }
   0x2   :  { %s21_s13 = sshll.u32 %s165_s12, 4  ;;  %s22_s13 = int_to_ptr.vmem [resolvable:$true] %s21_s13 }
   0x3   :  { %s129_s14 = scalar_lea.vmem %s22_s13, 256  ;;  %p134_p1 = scmp.lt.s32.totalorder %s22_s13, %s22_s13 }
   0x4   :  { %p130_p0 = scmp.ne.s32.totalorder %s22_s13, %s129_s14  ;;  %p135_p2 = scmp.lt.s32.totalorder %s129_s14, %s129_s14 }
   0x6   :  { %p136_p3 = por %p135_p2, %p134_p1 }
   0x8   :  { %p137_p4 = pnand %p136_p3, %p130_p0 }
   0xa   :  { %140 = shalt.err (!%p137_p4)
}
   0xb   :  { %s166_s15 = smov 128   ;;  %s167_s16 = smov 8  }
   0xc   :  { %27 = dma.hbm_to_vmem [thread:$0]  %s215_s2, 256, %s22_s13, [#allocation5], %s166_s15, %s166_s15, %s167_s16  }
   0xd   :  { %161 = dma.done.wait [#allocation5], 256  }
   0xe   :  { %162 = vsyncadd [#allocation5], 4294967040  ;;  %vm33_vm0 = vcmask 261120   ;;  %v31_v0 = vld [vmem:[#allocation4] sm:$0xff]  ;;  %v32_v1 = vld [vmem:[#allocation4 + $0x8] sm:$0xff]  ;;  %v78_v34 = vstv %s213_s0  ;;  %v83_v37 = vstv %s214_s1  ;;  %s168_s22 = smov [#allocation7]  }
   0xf   :  { %v34_v2 = vsel %vm33_vm0, %v31_v0, 0.0  ;;  %v40_v3 = vmul.f32 %v31_v0, %v31_v0  ;;  %v41_v4 = vmul.f32 %v32_v1, %v32_v1  ;;  %v37_v6 = vsel %vm33_vm0, %v32_v1, 0.0  ;;  %s97_s23 = sshll.u32 %s168_s22, 4  ;;  %s98_s23 = int_to_ptr.vmem [resolvable:$true] %s97_s23 }
  0x10   :  { %35 = vadd.xlane.f32.xlu0 %v34_v2  ;;  %s141_s0 = scalar_lea.vmem %s98_s23, 256  ;;  %p146_p6 = scmp.lt.s32.totalorder %s98_s23, %s98_s23 }
  0x11   :  { %v42_v5 = vsel %vm33_vm0, %v40_v3, 0.0  ;;  %v45_v7 = vsel %vm33_vm0, %v41_v4, 0.0  ;;  %p142_p5 = scmp.ne.s32.totalorder %s98_s23, %s141_s0  ;;  %p147_p7 = scmp.lt.s32.totalorder %s141_s0, %s141_s0 }
  0x12   :  { %43 = vadd.xlane.f32.xlu1 %v42_v5 }
  0x13   :  { %p148_p8 = por %p147_p7, %p146_p6 }
  0x14   :  { %38 = vadd.xlane.f32.xlu0 %v37_v6 }
  0x15   :  { %p149_p9 = pnand %p148_p8, %p142_p5 }
  0x16   :  { %46 = vadd.xlane.f32.xlu1 %v45_v7 }
  0x99   :  { %v36_v8 = vpop.xlane.xlu0 %35 }
  0x9a   :  { %v48_v9 = vmul.f32 0.03125, %v36_v8 }
  0x9b   :  { %v44_v10 = vpop.xlane.xlu1 %43 }
  0x9c   :  { %v50_v11 = vmul.f32 %v48_v9, %v36_v8 }
  0x9d   :  { %v39_v12 = vpop.xlane.xlu0 %38 }
  0x9e   :  { %v52_v13 = vsub.f32 %v44_v10, %v50_v11  ;;  %v49_v14 = vmul.f32 0.03125, %v39_v12 }
  0x9f   :  { %v47_v15 = vpop.xlane.xlu1 %46 }
  0xa0   :  { %v54_v16 = vmul.f32 0.032258064, %v52_v13  ;;  %v51_v17 = vmul.f32 %v49_v14, %v39_v12 }
  0xa2   :  { %v56_v18 = vmax.f32 %v54_v16, 0.0  ;;  %v53_v19 = vsub.f32 %v47_v15, %v51_v17 }
  0xa4   :  { %113 = vrsqrt.f32 %v56_v18  ;;  %v55_v20 = vmul.f32 0.032258064, %v53_v19  ;;  %vm60_vm1 = vcmp.eq.f32.partialorder %v56_v18, inf  ;;  %v63_v24 = vand.u32 2147483648, %v56_v18 }
  0xa5   :  { %vm62_vm2 = vcmp.eq.f32.partialorder %v56_v18, 0.0 }
  0xa6   :  { %v57_v21 = vmax.f32 %v55_v20, 0.0 }
  0xa8   :  { %115 = vrsqrt.f32 %v57_v21  ;;  %vm67_vm3 = vcmp.eq.f32.partialorder %v57_v21, inf  ;;  %v70_v30 = vand.u32 2147483648, %v57_v21  ;;  %vm69_vm4 = vcmp.eq.f32.partialorder %v57_v21, 0.0 }
  0xb1   :  { %v114_v22 = vpop.eup %113 }
  0xb2   :  { %v59_v23 = vmul.f32 %v114_v22, %v56_v18 }
  0xb4   :  { %v61_v25 = vsel %vm60_vm1, %v56_v18, %v59_v23 }
  0xb5   :  { %v64_v26 = vsel %vm62_vm2, %v63_v24, %v61_v25  ;;  %v116_v27 = vpop.eup %115 }
  0xb6   :  { %v74_v28 = vadd.f32 1e-06, %v64_v26  ;;  %v66_v29 = vmul.f32 %v116_v27, %v57_v21 }
  0xb8   :  { %117 = vrcp.f32 %v74_v28  ;;  %v68_v31 = vsel %vm67_vm3, %v57_v21, %v66_v29 }
  0xb9   :  { %v71_v32 = vsel %vm69_vm4, %v70_v30, %v68_v31 }
  0xba   :  { %v75_v33 = vadd.f32 1e-06, %v71_v32 }
  0xbc   :  { %119 = vrcp.f32 %v75_v33 }
  0xc5   :  { %v118_v35 = vpop.eup %117 }
  0xc6   :  { %v79_v36 = vmul.f32 %v118_v35, %v78_v34 }
  0xc8   :  { %v81_v38 = vmul.f32 %v79_v36, %v48_v9  ;;  %v86_v41 = vmul.f32 %v79_v36, %v31_v0 }
  0xc9   :  { %v120_v39 = vpop.eup %119 }
  0xca   :  { %v84_v40 = vsub.f32 %v83_v37, %v81_v38  ;;  %v80_v42 = vmul.f32 %v120_v39, %v78_v34 }
  0xcc   :  { %v88_v43 = vadd.f32 %v86_v41, %v84_v40  ;;  %v82_v44 = vmul.f32 %v80_v42, %v49_v14  ;;  %v87_v46 = vmul.f32 %v80_v42, %v32_v1 }
  0xce   :  { %90 = vst.msk [vmem:[#allocation7] sm:$0xff] %vm33_vm0, %v88_v43  ;;  %v85_v45 = vsub.f32 %v83_v37, %v82_v44 }
  0xd0   :  { %v89_v47 = vadd.f32 %v87_v46, %v85_v45 }
  0xd2   :  { %91 = vst.msk [vmem:[#allocation7 + $0x8] sm:$0xff] %vm33_vm0, %v89_v47 }
  0xd3   :  { %152 = shalt.err (!%p149_p9)
}
  0xd4   :  { %103 = dma.vmem_to_hbm [thread:$0]  %s98_s23, 256, %s216_s3, [#allocation6], %s166_s15, %s166_s15, %s167_s16  }
  0xd5   :  { %163 = dma.done.wait [#allocation6], 256  }
  0xd6   :  { %164 = vsyncadd [#allocation6], 4294967040 }
  0xd7   :  { %107 = vsyncpa [#allocation5], 1 }
  0xd8   :  { %108 = vsyncpa [#allocation6], 1 }

</bundles_post_ra>
